<compile_context>
chip_gen: v7x
topology: tpu7x:2x2x1
jax: 0.10.0
libtpu: 0.0.40
codegen_flags: <defaults>
</compile_context>

<pallas_src>
import jax
import jax.numpy as jnp
from jax.experimental import pallas as pl
from jax.experimental.pallas import tpu as pltpu

LANES = 128


def _cdiv(a, b):
    return -(-a // b)


def _round_up(x, m):
    return _cdiv(x, m) * m


def _default_parallel_chunks():
    # One chunk per TensorCore that the "parallel" grid axis can actually use.
    try:
        kind = jax.devices()[0].device_kind.lower()
    except Exception:
        return 1
    # v4 / v5p (megacore) and v7x expose two TensorCores; v5e / v6e have one.
    return 2 if any(tag in kind for tag in ("v4", "v5p", "v7")) else 1


def _bce_dice_reference(pred, target):
    """Pure-jnp reference (also the small-input fallback)."""
    B = pred.shape[0]
    p = pred.reshape(B, -1).astype(jnp.float32)
    t = target.reshape(B, -1).astype(jnp.float32)
    log_p = jnp.maximum(jnp.log(p), -100.0)
    log_1mp = jnp.maximum(jnp.log(1.0 - p), -100.0)
    bce = jnp.mean(-(t * log_p + (1.0 - t) * log_1mp))
    smooth = jnp.float32(1.0)
    inter = jnp.sum(p * t, axis=1)
    dice_score = (2.0 * inter + smooth) / (jnp.sum(p, axis=1) + jnp.sum(t, axis=1) + smooth)
    dice = 1.0 - jnp.mean(dice_score)
    return bce + dice


def bce_dice_loss(pred, target, *,
                  max_tile_rows=2048,
                  parallel_chunks=None,
                  pred_dtype=None,
                  target_dtype=None,
                  assume_binary_targets=False,
                  min_kernel_elems=1 << 15):
    """pred, target: (B, ...) probabilities / labels. Returns scalar BCE(mean) + Dice loss.

    pred_dtype / target_dtype: optional narrower HBM transfer dtype (e.g. bf16 on
    HBM-bound v5e/v6e; exact for 0/1 targets).  Math is always f32 in-kernel.
    assume_binary_targets=True uses the 1-log BCE path (wrong for soft labels).
    """
    B = pred.shape[0]
    p2 = pred.reshape(B, -1)
    t2 = target.reshape(B, -1)
    D = p2.shape[1]

    # Small-input fallback: kernel launch + tiling overhead would dominate.
    if B * D < int(min_kernel_elems):
        return _bce_dice_reference(pred, target)

    # Only cast when it actually changes the dtype (avoid a hidden HBM pass).
    if pred_dtype is not None and jnp.dtype(pred_dtype) != p2.dtype:
        p2 = p2.astype(pred_dtype)
    if target_dtype is not None and jnp.dtype(target_dtype) != t2.dtype:
        t2 = t2.astype(target_dtype)

    # (B, D) -> (B, rows0, 128) is a free reshape when D % 128 == 0.  Otherwise
    # pad the minimal amount to the next lane boundary; zero padding contributes
    # exactly 0 to the BCE sum (after the -100 clamp) and to every Dice sum.
    D_lane = _round_up(D, LANES)
    if D_lane != D:
        p2 = jnp.pad(p2, ((0, 0), (0, D_lane - D)))
        t2 = jnp.pad(t2, ((0, 0), (0, D_lane - D)))
    rows0 = D_lane // LANES
    p3 = p2.reshape(B, rows0, LANES)
    t3 = t2.reshape(B, rows0, LANES)

    # ---- static tiling decisions -------------------------------------------
    if parallel_chunks is None:
        P = _default_parallel_chunks()
    else:
        P = max(1, int(parallel_chunks))
    P = max(1, min(P, _cdiv(rows0, 8)))             # never more chunks than tiles
    rows_per_chunk = _cdiv(rows0, P)

    itemsize = max(jnp.dtype(p3.dtype).itemsize, jnp.dtype(t3.dtype).itemsize)
    bytes_per_row = B * LANES * itemsize
    budget_rows = max(8, (4 << 20) // bytes_per_row)   # ~4 MiB per input block
    T = min(int(max_tile_rows), budget_rows, _round_up(rows_per_chunk, 8))
    T = max(8, (T // 8) * 8)                           # sublane-aligned tile rows
    kpc = _cdiv(rows_per_chunk, T)                     # reduction steps per chunk
    needs_tail = (P * kpc * T) != rows0                # some block over-runs rows0

    def kernel(pred_ref, tgt_ref, stats_ref, acc_bce, acc_inter, acc_pt):
        i = pl.program_id(0)
        k = pl.program_id(1)

        @pl.when(k == 0)
        def _init():
            acc_bce[...] = jnp.zeros_like(acc_bce)
            acc_inter[...] = jnp.zeros_like(acc_inter)
            acc_pt[...] = jnp.zeros_like(acc_pt)

        row_start = (i * kpc + k) * T

        def accumulate(masked):
            p = pred_ref[...].astype(jnp.float32)
            t = tgt_ref[...].astype(jnp.float32)
            if assume_binary_targets:
                # 1 log/elem (EUP relief on v7x); only valid for hard 0/1 targets.
                bce_elem = -jnp.maximum(jnp.log(jnp.where(t > 0.5, p, 1.0 - p)), -100.0)
            else:
                # matches nn.BCELoss (log terms clamped at -100); rewritten as
                # -(log(1-p) + t*(log(p) - log(1-p))) to drop one VPU multiply.
                log_p = jnp.maximum(jnp.log(p), -100.0)
                log_1mp = jnp.maximum(jnp.log(1.0 - p), -100.0)
                bce_elem = -(log_1mp + t * (log_p - log_1mp))
            inter = p * t
            pt = p + t
            if masked:
                # Tail block: rows past the real data are undefined -> select 0
                # for all three sums (NaN-safe via where, not multiply).
                rid = row_start + jax.lax.broadcasted_iota(jnp.int32, (B, T, LANES), 1)
                valid = rid < rows0
                zero = jnp.zeros((), jnp.float32)
                bce_elem = jnp.where(valid, bce_elem, zero)
                inter = jnp.where(valid, inter, zero)
                pt = jnp.where(valid, pt, zero)
            # Per-step sublane partial reduce (XLU slot) into tiny lane partials;
            # keeps the hot loop free of full-tile accumulator vld/vst traffic.
            acc_bce[...] += jnp.sum(bce_elem, axis=1)
            acc_inter[...] += jnp.sum(inter, axis=1)
            acc_pt[...] += jnp.sum(pt, axis=1)

        if needs_tail:
            @pl.when(row_start + T <= rows0)
            def _full():
                accumulate(False)

            @pl.when(row_start + T > rows0)
            def _tail():
                accumulate(True)
        else:
            accumulate(False)

        @pl.when(k == pl.num_programs(1) - 1)
        def _finalize():
            stats_ref[0, 0, :, :] = acc_bce[...]
            stats_ref[0, 1, :, :] = acc_inter[...]
            stats_ref[0, 2, :, :] = acc_pt[...]

    # VMEM working set: 2 inputs x 2 pipeline buffers x one (B, T, 128) block,
    # plus tiny lane-partial scratch and the (1, 3, B, 128) output block.
    block_bytes = B * T * LANES * (jnp.dtype(p3.dtype).itemsize + jnp.dtype(t3.dtype).itemsize)
    need_bytes = 2 * block_bytes + 3 * B * LANES * 4 + 2 * 3 * B * LANES * 4 + (2 << 20)
    vmem_limit = int(min(32 << 20, max(need_bytes, 16 << 20)))

    valid_elems = B * D
    stats = pl.pallas_call(
        kernel,
        out_shape=jax.ShapeDtypeStruct((P, 3, B, LANES), jnp.float32),
        grid_spec=pltpu.PrefetchScalarGridSpec(
            num_scalar_prefetch=0,
            grid=(P, kpc),
            in_specs=[
                pl.BlockSpec((B, T, LANES), lambda i, k: (0, i * kpc + k, 0)),
                pl.BlockSpec((B, T, LANES), lambda i, k: (0, i * kpc + k, 0)),
            ],
            out_specs=pl.BlockSpec((1, 3, B, LANES), lambda i, k: (i, 0, 0, 0)),
            scratch_shapes=[
                pltpu.VMEM((B, LANES), jnp.float32),
                pltpu.VMEM((B, LANES), jnp.float32),
                pltpu.VMEM((B, LANES), jnp.float32),
            ],
        ),
        compiler_params=pltpu.CompilerParams(
            # TODO(synk): on v7x, switch axis 0 to pltpu.CORE_PARALLEL (or
            # pl.core_map over create_tensorcore_mesh) for a guaranteed 2-TC split.
            dimension_semantics=("parallel", "arbitrary"),
            vmem_limit_bytes=vmem_limit,
        ),
        cost_estimate=pl.CostEstimate(
            flops=12 * valid_elems,
            transcendentals=(1 if assume_binary_targets else 2) * valid_elems,
            bytes_accessed=(p3.size * jnp.dtype(p3.dtype).itemsize
                            + t3.size * jnp.dtype(t3.dtype).itemsize
                            + 4 * P * 3 * B * LANES),
        ),
    )(p3, t3)

    # Tiny final combine (O(B*128) work) outside the kernel.
    folded = stats.sum(axis=(0, 3))                     # (3, B)
    bce = folded[0].sum() / jnp.float32(B * D)          # true B*D (padding sums to 0)
    inter = folded[1]
    pt_sum = folded[2]
    smooth = jnp.float32(1.0)
    dice_score = (2.0 * inter + smooth) / (pt_sum + smooth)
    dice_loss = 1.0 - dice_score.sum() / jnp.float32(B)
    return bce + dice_loss


if __name__ == "__main__":
    key = jax.random.PRNGKey(0)
    k1, k2 = jax.random.split(key)
    B, C, H, W = 2, 4, 16, 16
    # pred: probabilities in (0, 1); target: binary mask
    pred = jax.nn.sigmoid(jax.random.normal(k1, (B, C, H, W), dtype=jnp.float32))
    target = (jax.random.uniform(k2, (B, C, H, W)) > 0.5).astype(jnp.float32)

    # min_kernel_elems=0 forces the Pallas path even at this small demo shape.
    loss_fn = jax.jit(lambda p, t: bce_dice_loss(p, t, min_kernel_elems=0))
    loss = jax.block_until_ready(loss_fn(pred, target))
    ref = jax.block_until_ready(_bce_dice_reference(pred, target))
    assert jnp.allclose(loss, ref, rtol=1e-5, atol=1e-5), (loss, ref)
    print("KERNEL_OK")
</pallas_src>

<mosaic_0001>
module attributes {stable_mosaic.version = 11 : i64} {
  func.func @kernel(%arg0: i32, %arg1: i32, %arg2: memref<2x8x128xf32, #tpu.memory_space<vmem>>, %arg3: memref<2x8x128xf32, #tpu.memory_space<vmem>>, %arg4: memref<1x3x2x128xf32, #tpu.memory_space<vmem>>, %arg5: memref<2x128xf32, #tpu.memory_space<vmem>>, %arg6: memref<2x128xf32, #tpu.memory_space<vmem>>, %arg7: memref<2x128xf32, #tpu.memory_space<vmem>>) attributes {dimension_semantics = [#tpu.dimension_semantics<parallel>, #tpu.dimension_semantics<arbitrary>], iteration_bounds = array<i64: 1, 1>, scalar_prefetch = 0 : i64, scratch_operands = 3 : i64, tpu.core_type = #tpu.core_type<tc>, window_params = [{transform_indices = @transform_0, window_bounds = array<i64: 2, 8, 128>}, {transform_indices = @transform_1, window_bounds = array<i64: 2, 8, 128>}, {transform_indices = @transform_2, window_bounds = array<i64: 1, 3, 2, 128>}]} {
    %c0_i32 = arith.constant 0 : i32
    %0 = arith.cmpi eq, %arg1, %c0_i32 : i32
    %1 = arith.extui %0 : i1 to i32
    %c0_i32_0 = arith.constant 0 : i32
    %2 = arith.cmpi ne, %1, %c0_i32_0 : i32
    scf.if %2 {
      %cst_26 = arith.constant 0.000000e+00 : f32
      %35 = vector.broadcast %cst_26 : f32 to vector<2x128xf32>
      %c0_27 = arith.constant 0 : index
      %c0_28 = arith.constant 0 : index
      %36 = vector.load %arg5[%c0_27, %c0_28] : memref<2x128xf32, #tpu.memory_space<vmem>>, vector<2x128xf32>
      tpu.vector_store %arg5[%c0_27, %c0_28], %35 {strides = array<i32>} : memref<2x128xf32, #tpu.memory_space<vmem>>, vector<2x128xf32>,
      %cst_29 = arith.constant 0.000000e+00 : f32
      %37 = vector.broadcast %cst_29 : f32 to vector<2x128xf32>
      %c0_30 = arith.constant 0 : index
      %c0_31 = arith.constant 0 : index
      %38 = vector.load %arg6[%c0_30, %c0_31] : memref<2x128xf32, #tpu.memory_space<vmem>>, vector<2x128xf32>
      tpu.vector_store %arg6[%c0_30, %c0_31], %37 {strides = array<i32>} : memref<2x128xf32, #tpu.memory_space<vmem>>, vector<2x128xf32>,
      %cst_32 = arith.constant 0.000000e+00 : f32
      %39 = vector.broadcast %cst_32 : f32 to vector<2x128xf32>
      %c0_33 = arith.constant 0 : index
      %c0_34 = arith.constant 0 : index
      %40 = vector.load %arg7[%c0_33, %c0_34] : memref<2x128xf32, #tpu.memory_space<vmem>>, vector<2x128xf32>
      tpu.vector_store %arg7[%c0_33, %c0_34], %39 {strides = array<i32>} : memref<2x128xf32, #tpu.memory_space<vmem>>, vector<2x128xf32>,
    } else {
    }
    %c0 = arith.constant 0 : index
    %c0_1 = arith.constant 0 : index
    %c0_2 = arith.constant 0 : index
    %3 = vector.load %arg2[%c0, %c0_1, %c0_2] : memref<2x8x128xf32, #tpu.memory_space<vmem>>, vector<2x8x128xf32>
    %c0_3 = arith.constant 0 : index
    %c0_4 = arith.constant 0 : index
    %c0_5 = arith.constant 0 : index
    %4 = vector.load %arg3[%c0_3, %c0_4, %c0_5] : memref<2x8x128xf32, #tpu.memory_space<vmem>>, vector<2x8x128xf32>
    %5 = math.log %3 : vector<2x8x128xf32>
    %cst = arith.constant -1.000000e+02 : f32
    %6 = vector.broadcast %cst : f32 to vector<2x8x128xf32>
    %7 = arith.maximumf %5, %6 : vector<2x8x128xf32>
    %cst_6 = arith.constant 1.000000e+00 : f32
    %8 = vector.broadcast %cst_6 : f32 to vector<2x8x128xf32>
    %9 = arith.subf %8, %3 : vector<2x8x128xf32>
    %10 = math.log %9 : vector<2x8x128xf32>
    %cst_7 = arith.constant -1.000000e+02 : f32
    %11 = vector.broadcast %cst_7 : f32 to vector<2x8x128xf32>
    %12 = arith.maximumf %10, %11 : vector<2x8x128xf32>
    %13 = arith.subf %7, %12 : vector<2x8x128xf32>
    %14 = arith.mulf %4, %13 : vector<2x8x128xf32>
    %15 = arith.addf %12, %14 : vector<2x8x128xf32>
    %cst_8 = arith.constant 0.000000e+00 : f32
    %16 = vector.broadcast %cst_8 : f32 to vector<2x8x128xf32>
    %17 = arith.subf %16, %15 : vector<2x8x128xf32>
    %18 = arith.mulf %3, %4 : vector<2x8x128xf32>
    %19 = arith.addf %3, %4 : vector<2x8x128xf32>
    %c0_9 = arith.constant 0 : index
    %c0_10 = arith.constant 0 : index
    %20 = vector.load %arg5[%c0_9, %c0_10] : memref<2x128xf32, #tpu.memory_space<vmem>>, vector<2x128xf32>
    %cst_11 = arith.constant dense<0.000000e+00> : vector<2x128xf32>
    %21 = vector.multi_reduction <add>, %17, %cst_11 [1] : vector<2x8x128xf32> to vector<2x128xf32>
    %22 = arith.addf %20, %21 : vector<2x128xf32>
    %c0_12 = arith.constant 0 : index
    %c0_13 = arith.constant 0 : index
    %23 = vector.load %arg5[%c0_12, %c0_13] : memref<2x128xf32, #tpu.memory_space<vmem>>, vector<2x128xf32>
    tpu.vector_store %arg5[%c0_12, %c0_13], %22 {strides = array<i32>} : memref<2x128xf32, #tpu.memory_space<vmem>>, vector<2x128xf32>,
    %c0_14 = arith.constant 0 : index
    %c0_15 = arith.constant 0 : index
    %24 = vector.load %arg6[%c0_14, %c0_15] : memref<2x128xf32, #tpu.memory_space<vmem>>, vector<2x128xf32>
    %cst_16 = arith.constant dense<0.000000e+00> : vector<2x128xf32>
    %25 = vector.multi_reduction <add>, %18, %cst_16 [1] : vector<2x8x128xf32> to vector<2x128xf32>
    %26 = arith.addf %24, %25 : vector<2x128xf32>
    %c0_17 = arith.constant 0 : index
    %c0_18 = arith.constant 0 : index
    %27 = vector.load %arg6[%c0_17, %c0_18] : memref<2x128xf32, #tpu.memory_space<vmem>>, vector<2x128xf32>
    tpu.vector_store %arg6[%c0_17, %c0_18], %26 {strides = array<i32>} : memref<2x128xf32, #tpu.memory_space<vmem>>, vector<2x128xf32>,
    %c0_19 = arith.constant 0 : index
    %c0_20 = arith.constant 0 : index
    %28 = vector.load %arg7[%c0_19, %c0_20] : memref<2x128xf32, #tpu.memory_space<vmem>>, vector<2x128xf32>
    %cst_21 = arith.constant dense<0.000000e+00> : vector<2x128xf32>
    %29 = vector.multi_reduction <add>, %19, %cst_21 [1] : vector<2x8x128xf32> to vector<2x128xf32>
    %30 = arith.addf %28, %29 : vector<2x128xf32>
    %c0_22 = arith.constant 0 : index
    %c0_23 = arith.constant 0 : index
    %31 = vector.load %arg7[%c0_22, %c0_23] : memref<2x128xf32, #tpu.memory_space<vmem>>, vector<2x128xf32>
    tpu.vector_store %arg7[%c0_22, %c0_23], %30 {strides = array<i32>} : memref<2x128xf32, #tpu.memory_space<vmem>>, vector<2x128xf32>,
    %c0_i32_24 = arith.constant 0 : i32
    %32 = arith.cmpi eq, %arg1, %c0_i32_24 : i32
    %33 = arith.extui %32 : i1 to i32
    %c0_i32_25 = arith.constant 0 : i32
    %34 = arith.cmpi ne, %33, %c0_i32_25 : i32
    scf.if %34 {
      %c0_26 = arith.constant 0 : index
      %c0_27 = arith.constant 0 : index
      %35 = vector.load %arg5[%c0_26, %c0_27] : memref<2x128xf32, #tpu.memory_space<vmem>>, vector<2x128xf32>
      %c0_28 = arith.constant 0 : index
      %c0_29 = arith.constant 0 : index
      %c0_30 = arith.constant 0 : index
      %c0_31 = arith.constant 0 : index
      %36 = vector.load %arg4[%c0_28, %c0_29, %c0_30, %c0_31] : memref<1x3x2x128xf32, #tpu.memory_space<vmem>>, vector<1x1x2x128xf32>
      %37 = vector.shape_cast %36 : vector<1x1x2x128xf32> to vector<2x128xf32>
      %38 = vector.shape_cast %35 : vector<2x128xf32> to vector<1x1x2x128xf32>
      tpu.vector_store %arg4[%c0_28, %c0_29, %c0_30, %c0_31], %38 {strides = array<i32>} : memref<1x3x2x128xf32, #tpu.memory_space<vmem>>, vector<1x1x2x128xf32>,
      %c0_32 = arith.constant 0 : index
      %c0_33 = arith.constant 0 : index
      %39 = vector.load %arg6[%c0_32, %c0_33] : memref<2x128xf32, #tpu.memory_space<vmem>>, vector<2x128xf32>
      %c0_34 = arith.constant 0 : index
      %c1 = arith.constant 1 : index
      %c0_35 = arith.constant 0 : index
      %c0_36 = arith.constant 0 : index
      %40 = vector.load %arg4[%c0_34, %c1, %c0_35, %c0_36] : memref<1x3x2x128xf32, #tpu.memory_space<vmem>>, vector<1x1x2x128xf32>
      %41 = vector.shape_cast %40 : vector<1x1x2x128xf32> to vector<2x128xf32>
      %42 = vector.shape_cast %39 : vector<2x128xf32> to vector<1x1x2x128xf32>
      tpu.vector_store %arg4[%c0_34, %c1, %c0_35, %c0_36], %42 {strides = array<i32>} : memref<1x3x2x128xf32, #tpu.memory_space<vmem>>, vector<1x1x2x128xf32>,
      %c0_37 = arith.constant 0 : index
      %c0_38 = arith.constant 0 : index
      %43 = vector.load %arg7[%c0_37, %c0_38] : memref<2x128xf32, #tpu.memory_space<vmem>>, vector<2x128xf32>
      %c0_39 = arith.constant 0 : index
      %c2 = arith.constant 2 : index
      %c0_40 = arith.constant 0 : index
      %c0_41 = arith.constant 0 : index
      %44 = vector.load %arg4[%c0_39, %c2, %c0_40, %c0_41] : memref<1x3x2x128xf32, #tpu.memory_space<vmem>>, vector<1x1x2x128xf32>
      %45 = vector.shape_cast %44 : vector<1x1x2x128xf32> to vector<2x128xf32>
      %46 = vector.shape_cast %43 : vector<2x128xf32> to vector<1x1x2x128xf32>
      tpu.vector_store %arg4[%c0_39, %c2, %c0_40, %c0_41], %46 {strides = array<i32>} : memref<1x3x2x128xf32, #tpu.memory_space<vmem>>, vector<1x1x2x128xf32>,
    } else {
    }
    return
  }
  func.func @transform_0(%arg0: i32, %arg1: i32) -> (i32, i32, i32) {
    %c1_i32 = arith.constant 1 : i32
    %0 = arith.muli %arg0, %c1_i32 : i32
    %1 = arith.addi %0, %arg1 : i32
    %c0_i32 = arith.constant 0 : i32
    %c0_i32_0 = arith.constant 0 : i32
    %c0_i32_1 = arith.constant 0 : i32
    return %c0_i32, %1, %c0_i32_0 : i32, i32, i32
  }
  func.func @transform_1(%arg0: i32, %arg1: i32) -> (i32, i32, i32) {
    %c1_i32 = arith.constant 1 : i32
    %0 = arith.muli %arg0, %c1_i32 : i32
    %1 = arith.addi %0, %arg1 : i32
    %c0_i32 = arith.constant 0 : i32
    %c0_i32_0 = arith.constant 0 : i32
    %c0_i32_1 = arith.constant 0 : i32
    return %c0_i32, %1, %c0_i32_0 : i32, i32, i32
  }
  func.func @transform_2(%arg0: i32, %arg1: i32) -> (i32, i32, i32, i32) {
    %c0_i32 = arith.constant 0 : i32
    %c0_i32_0 = arith.constant 0 : i32
    %c0_i32_1 = arith.constant 0 : i32
    %c0_i32_2 = arith.constant 0 : i32
    return %arg0, %c0_i32, %c0_i32_0, %c0_i32_1 : i32, i32, i32, i32
  }
}

</mosaic_0001>

<bundles_post_ra>
// kernel: _lambda_.1
= control target key start
LH: loop header
LB: loop body
LE: loop exit
PB: predicated region body
PF: predicated region fallthrough
CT: control target
= control target key end

     0   :  { %v178_v0 = vmov 0.0   ;;  %vm97_vm0 = vcmask 1041409   ;;  %s218_s0 = inlined_call_operand.vmem [shape: f32[2,8,128], index: 0, kind: input, shape index: {}]   ;;  %s219_s1 = inlined_call_operand.vmem [shape: f32[2,8,128], index: 1, kind: input, shape index: {}]   ;;  %s220_s2 = inlined_call_operand.vmem [shape: f32[1,3,2,128], index: 2, kind: output, shape index: {}]  }
   0x1   :  { %49 = vst [vmem:[#allocation2] sm:$0x3] %v178_v0  ;;  %50 = vst [vmem:[#allocation3] sm:$0x3] %v178_v0  ;;  %v52_v1 = vld [vmem:[%s218_s0] sm:$0xff]  ;;  %v53_v2 = vld [vmem:[%s218_s0 + $0x8] sm:$0xff] }
   0x2   :  { %51 = vst [vmem:[#allocation4] sm:$0x3] %v178_v0  ;;  %v54_v3 = vld [vmem:[%s219_s1] sm:$0xff]  ;;  %v55_v4 = vld [vmem:[%s219_s1 + $0x8] sm:$0xff]  ;;  %170 = vlog2.f32 %v52_v1  ;;  %v62_v5 = vsub.f32 1.0, %v52_v1  ;;  %v63_v6 = vsub.f32 1.0, %v53_v2 }
   0x3   :  { %v78_v7 = vmul.f32 %v54_v3, %v52_v1  ;;  %172 = vlog2.f32 %v53_v2  ;;  %v79_v8 = vmul.f32 %v55_v4, %v53_v2  ;;  %v80_v9 = vadd.f32 %v54_v3, %v52_v1 }
   0x4   :  { %v81_v10 = vadd.f32 %v55_v4, %v53_v2  ;;  %174 = vlog2.f32 %v62_v5 }
   0x5   :  { %v103_v11 = vrot.slane %v78_v7, 4  ;;  %176 = vlog2.f32 %v63_v6  ;;  %v109_v12 = vrot.slane %v79_v8, 4  ;;  %v122_v13 = vrot.slane %v80_v9, 4 }
   0x6   :  { %v128_v14 = vrot.slane %v81_v10, 4 }
   0x7   :  { %v104_v15 = vadd.f32 %v103_v11, %v78_v7  ;;  %v110_v16 = vadd.f32 %v109_v12, %v79_v8  ;;  %v123_v17 = vadd.f32 %v122_v13, %v80_v9 }
   0x8   :  { %v129_v18 = vadd.f32 %v128_v14, %v81_v10  ;;  %v102_v40 = vld [vmem:[#allocation3] sm:$0x3]  ;;  %v82_v10 = vld [vmem:[#allocation2] sm:$0x3] }
   0x9   :  { %v105_v19 = vrot.slane %v104_v15, 2  ;;  %v111_v20 = vrot.slane %v110_v16, 2  ;;  %v124_v21 = vrot.slane %v123_v17, 2  ;;  %v121_v45 = vld [vmem:[#allocation4] sm:$0x3] }
   0xa   :  { %v130_v22 = vrot.slane %v129_v18, 2 }
   0xb   :  { %v106_v23 = vadd.f32 %v105_v19, %v104_v15  ;;  %v112_v24 = vadd.f32 %v111_v20, %v110_v16  ;;  %v125_v25 = vadd.f32 %v124_v21, %v123_v17 }
   0xc   :  { %v131_v26 = vadd.f32 %v130_v22, %v129_v18  ;;  %v171_v27 = vpop.eup %170 }
   0xd   :  { %v107_v28 = vrot.slane %v106_v23, 1  ;;  %v173_v29 = vpop.eup %172  ;;  %v57_v30 = vmul.f32 0.6931472, %v171_v27  ;;  %v113_v31 = vrot.slane %v112_v24, 1  ;;  %v126_v32 = vrot.slane %v125_v25, 1 }
   0xe   :  { %v132_v33 = vrot.slane %v131_v26, 1  ;;  %v175_v34 = vpop.eup %174  ;;  %v59_v35 = vmul.f32 0.6931472, %v173_v29 }
   0xf   :  { %v108_v36 = vadd.f32 %v107_v28, %v106_v23  ;;  %v177_v37 = vpop.eup %176  ;;  %v60_v38 = vmax.f32 %v57_v30, -100.0  ;;  %v65_v39 = vmul.f32 0.6931472, %v175_v34  ;;  %v114_v41 = vadd.f32 %v113_v31, %v112_v24 }
  0x10   :  { %v127_v42 = vadd.f32 %v126_v32, %v125_v25  ;;  %v61_v43 = vmax.f32 %v59_v35, -100.0  ;;  %v67_v44 = vmul.f32 0.6931472, %v177_v37  ;;  %v133_v46 = vadd.f32 %v132_v33, %v131_v26 }
  0x11   :  { %v68_v47 = vmax.f32 %v65_v39, -100.0  ;;  %v117_v48 = vsel %vm97_vm0, %v114_v41, %v108_v36 }
  0x12   :  { %v69_v49 = vmax.f32 %v67_v44, -100.0  ;;  %v119_v50 = vadd.f32 %v117_v48, %v102_v40  ;;  %v136_v51 = vsel %vm97_vm0, %v133_v46, %v127_v42 }
  0x13   :  { %v70_v52 = vsub.f32 %v60_v38, %v68_v47  ;;  %v138_v53 = vadd.f32 %v136_v51, %v121_v45 }
  0x14   :  { %v71_v54 = vsub.f32 %v61_v43, %v69_v49  ;;  %120 = vst [vmem:[#allocation3] sm:$0x3] %v119_v50 }
  0x15   :  { %v72_v55 = vmul.f32 %v70_v52, %v54_v3  ;;  %139 = vst [vmem:[#allocation4] sm:$0x3] %v138_v53 }
  0x16   :  { %v73_v56 = vmul.f32 %v71_v54, %v55_v4 }
  0x17   :  { %v74_v57 = vadd.f32 %v72_v55, %v68_v47 }
  0x18   :  { %v75_v58 = vadd.f32 %v73_v56, %v69_v49 }
  0x19   :  { %v76_v59 = vsub.f32 0.0, %v74_v57 }
  0x1a   :  { %v77_v60 = vsub.f32 0.0, %v75_v58 }
  0x1b   :  { %v83_v61 = vrot.slane %v76_v59, 4  ;;  %v145_v62 = vld [vmem:[#allocation3] sm:$0x3] }
  0x1c   :  { %v89_v63 = vrot.slane %v77_v60, 4  ;;  %167 = vst [vmem:[%s220_s2 + $0x2] sm:$0x3] %v145_v62  ;;  %v148_v0 = vld [vmem:[#allocation4] sm:$0x3] }
  0x1d   :  { %v84_v1 = vadd.f32 %v83_v61, %v76_v59  ;;  %168 = vst [vmem:[%s220_s2 + $0x4] sm:$0x3] %v148_v0 }
  0x1e   :  { %v90_v2 = vadd.f32 %v89_v63, %v77_v60 }
  0x1f   :  { %v85_v3 = vrot.slane %v84_v1, 2 }
  0x20   :  { %v91_v4 = vrot.slane %v90_v2, 2 }
  0x21   :  { %v86_v5 = vadd.f32 %v85_v3, %v84_v1 }
  0x22   :  { %v92_v6 = vadd.f32 %v91_v4, %v90_v2 }
  0x23   :  { %v87_v7 = vrot.slane %v86_v5, 1 }
  0x24   :  { %v93_v8 = vrot.slane %v92_v6, 1 }
  0x25   :  { %v88_v9 = vadd.f32 %v87_v7, %v86_v5 }
  0x26   :  { %v94_v11 = vadd.f32 %v93_v8, %v92_v6 }
  0x28   :  { %v98_v12 = vsel %vm97_vm0, %v94_v11, %v88_v9 }
  0x29   :  { %v100_v13 = vadd.f32 %v98_v12, %v82_v10 }
  0x2b   :  { %101 = vst [vmem:[#allocation2] sm:$0x3] %v100_v13 }
  0x32   :  { %v143_v14 = vld [vmem:[#allocation2] sm:$0x3] }
  0x33   :  { %144 = vst [vmem:[%s220_s2] sm:$0x3] %v143_v14 }

</bundles_post_ra>
